<compile_context>
chip_gen: v7x
topology: tpu7x:2x2x1
jax: 0.10.0
libtpu: 0.0.40
codegen_flags: <defaults>
</compile_context>

<pallas_src>
import functools

import jax
import jax.numpy as jnp
from jax.experimental import pallas as pl
from jax.experimental.pallas import tpu as pltpu


# ----------------------------- Pallas kernel --------------------------------

def _fused_forward_kernel(*refs, num_pre_mp: int):
    """One node-tile of the fused MLP forward.

    refs layout:
      refs[0]                 : x tile        (tile_n, dim_in)
      refs[1 + 2*l], refs[2+2*l]: (W, b) for layer l (pre_mp layers then head)
      refs[-1]                : output tile   (tile_n, dim_out)
    """
    x_ref = refs[0]
    o_ref = refs[-1]
    wb_refs = refs[1:-1]

    h = x_ref[...]
    num_layers = num_pre_mp + 1  # pre_mp stack + node head
    for li in range(num_layers):
        w_ref = wb_refs[2 * li]
        b_ref = wb_refs[2 * li + 1]
        h = jnp.dot(h, w_ref[...], preferred_element_type=jnp.float32)
        h = h + b_ref[...]
        if li < num_pre_mp:           # GeneralLayer: Linear + ReLU (final_act=True)
            h = jnp.maximum(h, 0.0)
    o_ref[...] = h.astype(o_ref.dtype)


def fused_multimodel_mlp(x, pre_mp_params, head_params, *, max_tile_n: int = 512):
    """Fully fused: relu(relu(x@W1+b1)@W2+b2) ... @ Wh + bh in one pallas_call.

    Weights/biases are VMEM-resident (constant index_map); only the node
    dimension is tiled.
    """
    n, dim_in = x.shape
    num_pre_mp = len(pre_mp_params)
    dim_out = head_params[0].shape[1]

    # --- choose node tile & pad N (no divisibility requirement on callers) ---
    def _round_up(v, m):
        return ((v + m - 1) // m) * m

    n_pad8 = _round_up(n, 8)                 # sublane multiple
    if n_pad8 <= max_tile_n:
        tile_n = n_pad8                      # small graph: single grid step
    else:
        tile_n = max_tile_n                  # large graph: deep tiles, >=2 steps
    n_padded = _round_up(n_pad8, tile_n)
    if n_padded != n:
        x = jnp.pad(x, ((0, n_padded - n), (0, 0)))

    # --- assemble flat input list: x, then (W, b2d) per layer, head last ---
    layer_params = list(pre_mp_params) + [head_params]
    inputs = [x]
    in_specs = [pl.BlockSpec((tile_n, dim_in), lambda i: (i, 0))]
    for (w, b) in layer_params:
        k, m = w.shape
        inputs.append(w)
        inputs.append(b.reshape(1, m))
        # Constant index maps -> weights/biases stay resident in VMEM.
        in_specs.append(pl.BlockSpec((k, m), lambda i: (0, 0)))
        in_specs.append(pl.BlockSpec((1, m), lambda i: (0, 0)))

    kernel = functools.partial(_fused_forward_kernel, num_pre_mp=num_pre_mp)

    out = pl.pallas_call(
        kernel,
        out_shape=jax.ShapeDtypeStruct((n_padded, dim_out), x.dtype),
        grid_spec=pltpu.PrefetchScalarGridSpec(
            num_scalar_prefetch=0,
            grid=(n_padded // tile_n,),
            in_specs=in_specs,
            # TODO(synk): out last-dim (8/32) < 128 lowers to masked stores; a
            # lane-dense repack only pays off at much larger graph sizes.
            out_specs=pl.BlockSpec((tile_n, dim_out), lambda i: (i, 0)),
        ),
        compiler_params=pltpu.CompilerParams(
            dimension_semantics=("parallel",)),
    )(*inputs)

    return out[:n] if n_padded != n else out


# --------------------------- Model construction -----------------------------

CFG = dict(
    dataset_node_encoder=False,
    dataset_edge_encoder=False,
    gt_layer_type="CustomGatedGCN+Transformer",
    gnn_layers_pre_mp=2,
    gnn_dim_inner=32,
    gt_dim_hidden=32,
    gnn_batchnorm=False,
    gnn_dropout=0.0,
    gnn_act="relu",
    gt_layers=2,
    gt_n_heads=4,
    gt_dropout=0.0,
    gt_attn_dropout=0.0,
    gt_layer_norm=False,
    gt_batch_norm=True,
    gnn_head="node",
    bn_eps=1e-5,
    bn_mom=0.1,
    mem_inplace=False,
)


def init_multimodel_params(dim_in, dim_out, cfg, key):
    """Deterministic synthetic parameter init matching the module's shapes."""
    params = {"pre_mp": [], "head": None}
    dims = [dim_in] + [cfg["gnn_dim_inner"]] * cfg["gnn_layers_pre_mp"]
    for i in range(cfg["gnn_layers_pre_mp"]):
        key, kw, kb = jax.random.split(key, 3)
        d_in, d_o = dims[i], dims[i + 1]
        w = jax.random.normal(kw, (d_in, d_o), jnp.float32) * (1.0 / jnp.sqrt(d_in))
        b = jax.random.normal(kb, (d_o,), jnp.float32) * 0.01
        params["pre_mp"].append((w, b))
    key, kw, kb = jax.random.split(key, 3)
    d_in = cfg["gnn_dim_inner"]
    w = jax.random.normal(kw, (d_in, dim_out), jnp.float32) * (1.0 / jnp.sqrt(d_in))
    b = jax.random.normal(kb, (dim_out,), jnp.float32) * 0.01
    params["head"] = (w, b)
    return params


def multimodel_forward(x, params, cfg):
    """Forward pass of MultiModel on node features x: [num_nodes, dim_in]."""
    # FeatureEncoder: node/edge encoders disabled in cfg -> identity (exact).
    #
    # pre_mp (GNNPreMP = 2 x (Linear + ReLU)) and post_mp (node head Linear)
    # are fused into a single Pallas kernel with VMEM-resident weights.
    #
    # TODO(synk): self.layers (GPS MultiLayer: local MPNN + global attention)
    # source is not provided by the module; left as identity rather than faking
    # its semantics.
    return fused_multimodel_mlp(x, params["pre_mp"], params["head"])


# --------------------------------- Main --------------------------------------

if __name__ == "__main__":
    key = jax.random.PRNGKey(0)
    num_nodes, dim_in, dim_out = 128, 16, 8

    kx, kp = jax.random.split(key)
    x = jax.random.normal(kx, (num_nodes, dim_in), jnp.float32)
    params = init_multimodel_params(dim_in, dim_out, CFG, kp)

    out = multimodel_forward(x, params, CFG)
    out = jax.block_until_ready(out)

    assert out.shape == (num_nodes, dim_out)
    assert out.dtype == jnp.float32

    # quick numerical sanity check against plain-JAX reference
    ref = x
    for (w, b) in params["pre_mp"]:
        ref = jnp.maximum(ref @ w + b, 0.0)
    wh, bh = params["head"]
    ref = ref @ wh + bh
    assert jnp.allclose(out, ref, atol=1e-4, rtol=1e-4)

    print("KERNEL_OK")
</pallas_src>

<mosaic_0001>
module attributes {stable_mosaic.version = 11 : i64} {
  func.func @_fused_forward_kernel(%arg0: i32, %arg1: memref<128x16xf32, #tpu.memory_space<vmem>>, %arg2: memref<16x32xf32, #tpu.memory_space<vmem>>, %arg3: memref<1x32xf32, #tpu.memory_space<vmem>>, %arg4: memref<32x32xf32, #tpu.memory_space<vmem>>, %arg5: memref<1x32xf32, #tpu.memory_space<vmem>>, %arg6: memref<32x8xf32, #tpu.memory_space<vmem>>, %arg7: memref<1x8xf32, #tpu.memory_space<vmem>>, %arg8: memref<128x8xf32, #tpu.memory_space<vmem>>) attributes {dimension_semantics = [#tpu.dimension_semantics<parallel>], iteration_bounds = array<i64: 1>, scalar_prefetch = 0 : i64, scratch_operands = 0 : i64, tpu.core_type = #tpu.core_type<tc>, window_params = [{transform_indices = @transform_0, window_bounds = array<i64: 128, 16>}, {pipeline_mode = #tpu.pipeline_mode<synchronous>, transform_indices = @transform_1, window_bounds = array<i64: 16, 32>}, {pipeline_mode = #tpu.pipeline_mode<synchronous>, transform_indices = @transform_2, window_bounds = array<i64: 1, 32>}, {pipeline_mode = #tpu.pipeline_mode<synchronous>, transform_indices = @transform_3, window_bounds = array<i64: 32, 32>}, {pipeline_mode = #tpu.pipeline_mode<synchronous>, transform_indices = @transform_4, window_bounds = array<i64: 1, 32>}, {pipeline_mode = #tpu.pipeline_mode<synchronous>, transform_indices = @transform_5, window_bounds = array<i64: 32, 8>}, {pipeline_mode = #tpu.pipeline_mode<synchronous>, transform_indices = @transform_6, window_bounds = array<i64: 1, 8>}, {transform_indices = @transform_7, window_bounds = array<i64: 128, 8>}]} {
    %c0 = arith.constant 0 : index
    %c0_0 = arith.constant 0 : index
    %0 = vector.load %arg1[%c0, %c0_0] : memref<128x16xf32, #tpu.memory_space<vmem>>, vector<128x16xf32>
    %c0_1 = arith.constant 0 : index
    %c0_2 = arith.constant 0 : index
    %1 = vector.load %arg2[%c0_1, %c0_2] : memref<16x32xf32, #tpu.memory_space<vmem>>, vector<16x32xf32>
    %cst = arith.constant dense<0.000000e+00> : vector<128x32xf32>
    %2 = tpu.matmul %0, %1, %cst {dimension_numbers = #tpu.dot_dimension_numbers<[1], [0], [0], [1], [0, 0, 1, 1], [], []>} : vector<128x16xf32>, vector<16x32xf32>, vector<128x32xf32> -> vector<128x32xf32>
    %c0_3 = arith.constant 0 : index
    %c0_4 = arith.constant 0 : index
    %3 = vector.load %arg3[%c0_3, %c0_4] : memref<1x32xf32, #tpu.memory_space<vmem>>, vector<1x32xf32>
    %4 = vector.broadcast %3 : vector<1x32xf32> to vector<128x32xf32>
    %5 = arith.addf %2, %4 : vector<128x32xf32>
    %cst_5 = arith.constant 0.000000e+00 : f32
    %6 = vector.broadcast %cst_5 : f32 to vector<128x32xf32>
    %7 = arith.maximumf %5, %6 : vector<128x32xf32>
    %c0_6 = arith.constant 0 : index
    %c0_7 = arith.constant 0 : index
    %8 = vector.load %arg4[%c0_6, %c0_7] : memref<32x32xf32, #tpu.memory_space<vmem>>, vector<32x32xf32>
    %cst_8 = arith.constant dense<0.000000e+00> : vector<128x32xf32>
    %9 = tpu.matmul %7, %8, %cst_8 {dimension_numbers = #tpu.dot_dimension_numbers<[1], [0], [0], [1], [0, 0, 1, 1], [], []>} : vector<128x32xf32>, vector<32x32xf32>, vector<128x32xf32> -> vector<128x32xf32>
    %c0_9 = arith.constant 0 : index
    %c0_10 = arith.constant 0 : index
    %10 = vector.load %arg5[%c0_9, %c0_10] : memref<1x32xf32, #tpu.memory_space<vmem>>, vector<1x32xf32>
    %11 = vector.broadcast %10 : vector<1x32xf32> to vector<128x32xf32>
    %12 = arith.addf %9, %11 : vector<128x32xf32>
    %cst_11 = arith.constant 0.000000e+00 : f32
    %13 = vector.broadcast %cst_11 : f32 to vector<128x32xf32>
    %14 = arith.maximumf %12, %13 : vector<128x32xf32>
    %c0_12 = arith.constant 0 : index
    %c0_13 = arith.constant 0 : index
    %15 = vector.load %arg6[%c0_12, %c0_13] : memref<32x8xf32, #tpu.memory_space<vmem>>, vector<32x8xf32>
    %cst_14 = arith.constant dense<0.000000e+00> : vector<128x8xf32>
    %16 = tpu.matmul %14, %15, %cst_14 {dimension_numbers = #tpu.dot_dimension_numbers<[1], [0], [0], [1], [0, 0, 1, 1], [], []>} : vector<128x32xf32>, vector<32x8xf32>, vector<128x8xf32> -> vector<128x8xf32>
    %c0_15 = arith.constant 0 : index
    %c0_16 = arith.constant 0 : index
    %17 = vector.load %arg7[%c0_15, %c0_16] : memref<1x8xf32, #tpu.memory_space<vmem>>, vector<1x8xf32>
    %18 = vector.broadcast %17 : vector<1x8xf32> to vector<128x8xf32>
    %19 = arith.addf %16, %18 : vector<128x8xf32>
    %c0_17 = arith.constant 0 : index
    %c0_18 = arith.constant 0 : index
    %20 = vector.load %arg8[%c0_17, %c0_18] : memref<128x8xf32, #tpu.memory_space<vmem>>, vector<128x8xf32>
    tpu.vector_store %arg8[%c0_17, %c0_18], %19 {strides = array<i32>} : memref<128x8xf32, #tpu.memory_space<vmem>>, vector<128x8xf32>,
    return
  }
  func.func @transform_0(%arg0: i32) -> (i32, i32) {
    %c0_i32 = arith.constant 0 : i32
    %c0_i32_0 = arith.constant 0 : i32
    return %arg0, %c0_i32 : i32, i32
  }
  func.func @transform_1(%arg0: i32) -> (i32, i32) {
    %c0_i32 = arith.constant 0 : i32
    %c0_i32_0 = arith.constant 0 : i32
    %c0_i32_1 = arith.constant 0 : i32
    return %c0_i32, %c0_i32_0 : i32, i32
  }
  func.func @transform_2(%arg0: i32) -> (i32, i32) {
    %c0_i32 = arith.constant 0 : i32
    %c0_i32_0 = arith.constant 0 : i32
    %c0_i32_1 = arith.constant 0 : i32
    return %c0_i32, %c0_i32_0 : i32, i32
  }
  func.func @transform_3(%arg0: i32) -> (i32, i32) {
    %c0_i32 = arith.constant 0 : i32
    %c0_i32_0 = arith.constant 0 : i32
    %c0_i32_1 = arith.constant 0 : i32
    return %c0_i32, %c0_i32_0 : i32, i32
  }
  func.func @transform_4(%arg0: i32) -> (i32, i32) {
    %c0_i32 = arith.constant 0 : i32
    %c0_i32_0 = arith.constant 0 : i32
    %c0_i32_1 = arith.constant 0 : i32
    return %c0_i32, %c0_i32_0 : i32, i32
  }
  func.func @transform_5(%arg0: i32) -> (i32, i32) {
    %c0_i32 = arith.constant 0 : i32
    %c0_i32_0 = arith.constant 0 : i32
    %c0_i32_1 = arith.constant 0 : i32
    return %c0_i32, %c0_i32_0 : i32, i32
  }
  func.func @transform_6(%arg0: i32) -> (i32, i32) {
    %c0_i32 = arith.constant 0 : i32
    %c0_i32_0 = arith.constant 0 : i32
    %c0_i32_1 = arith.constant 0 : i32
    return %c0_i32, %c0_i32_0 : i32, i32
  }
  func.func @transform_7(%arg0: i32) -> (i32, i32) {
    %c0_i32 = arith.constant 0 : i32
    %c0_i32_0 = arith.constant 0 : i32
    return %arg0, %c0_i32 : i32, i32
  }
}

</mosaic_0001>

<bundles_post_ra>
// kernel: tpu_custom_call.1
= control target key start
LH: loop header
LB: loop body
LE: loop exit
PB: predicated region body
PF: predicated region fallthrough
CT: control target
= control target key end

     0   :  { %vm51_vm0 = vcmask 130048   ;;  %vm272_vm1 = vcmask 261120   ;;  %vm686_vm2 = vcmask 64512   ;;  %s1169_s1 = inlined_call_operand.vmem [shape: f32[16,32], index: 1, kind: input, shape index: {}]   ;;  %s1170_s0 = inlined_call_operand.vmem [shape: f32[128,16], index: 0, kind: input, shape index: {}]   ;;  %s1171_s3 = inlined_call_operand.vmem [shape: f32[32,32], index: 3, kind: input, shape index: {}]   ;;  %s1172_s5 = inlined_call_operand.vmem [shape: f32[32,8], index: 5, kind: input, shape index: {}]   ;;  %s1173_s2 = inlined_call_operand.vmem [shape: f32[1,32], index: 2, kind: input, shape index: {}]   ;;  %s1174_s4 = inlined_call_operand.vmem [shape: f32[1,32], index: 4, kind: input, shape index: {}]   ;;  %s1175_s6 = inlined_call_operand.vmem [shape: f32[1,8], index: 6, kind: input, shape index: {}]   ;;  %s1176_s7 = inlined_call_operand.vmem [shape: f32[128,8], index: 7, kind: output, shape index: {}]  }
   0x1   :  { %v42_v0 = vld [vmem:[%s1169_s1] sm:$0xff]  ;;  %v43_v1 = vld [vmem:[%s1169_s1 + $0x8] sm:$0xff]  ;;  %v28_v7 = vld [vmem:[%s1170_s0 + $0x10] sm:$0xff] }
   0x2   :  { %v26_v2 = vld [vmem:[%s1170_s0] sm:$0xff]  ;;  %v908_v3 = vpack.c.bf16 %v43_v1, %v42_v0  ;;  %v27_v5 = vld [vmem:[%s1170_s0 + $0x8] sm:$0xff]  ;;  %v36_v8 = vld [vmem:[%s1170_s0 + $0x50] sm:$0xff] }
   0x3   :  { %820 = vmatprep.mubr.msk.f32.mxu0 %vm51_vm0, %v26_v2  ;;  %v34_v4 = vld [vmem:[%s1170_s0 + $0x40] sm:$0xff]  ;;  %v35_v6 = vld [vmem:[%s1170_s0 + $0x48] sm:$0xff]  ;;  %v263_v11 = vld [vmem:[%s1171_s3 + $0x10] sm:$0xff] }
   0x4   :  { %909 = vmatprep.subr.bf16.mxu0 %v908_v3  ;;  %928 = vmatprep.subr.bf16.mxu1 %v908_v3  ;;  %v261_v9 = vld [vmem:[%s1171_s3] sm:$0xff]  ;;  %v262_v10 = vld [vmem:[%s1171_s3 + $0x8] sm:$0xff]  ;;  %v264_v13 = vld [vmem:[%s1171_s3 + $0x18] sm:$0xff] }
   0x5   :  { %911 = vmatpush3.bf16.msra.mxu0 %v908_v3  ;;  %929 = vmatpush3.bf16.msra.mxu1 %v908_v3  ;;  %v912_v12 = vpack.c.bf16 %v262_v10, %v261_v9  ;;  %v29_v14 = vld [vmem:[%s1170_s0 + $0x18] sm:$0xff]  ;;  %v30_v16 = vld [vmem:[%s1170_s0 + $0x20] sm:$0xff]  ;;  %v916_v18 = vpack.c.bf16 %v264_v13, %v263_v11  ;;  %v31_v19 = vld [vmem:[%s1170_s0 + $0x28] sm:$0xff] }
   0x6   :  { %832 = vmatprep.mubr.msk.f32.mxu1 %vm51_vm0, %v34_v4  ;;  %v37_v15 = vld [vmem:[%s1170_s0 + $0x58] sm:$0xff]  ;;  %v38_v17 = vld [vmem:[%s1170_s0 + $0x60] sm:$0xff]  ;;  %v39_v20 = vld [vmem:[%s1170_s0 + $0x68] sm:$0xff] }
   0x7   :  { %913 = vmatprep.subr.bf16.mxu1 %v912_v12  ;;  %v32_v21 = vld [vmem:[%s1170_s0 + $0x30] sm:$0xff]  ;;  %v33_v23 = vld [vmem:[%s1170_s0 + $0x38] sm:$0xff]  ;;  %v482_v25 = vld [vmem:[%s1172_s5] sm:$0xff] }
   0x8   :  { %821 = vmatmul.mubr.msk.f32.vlgmr.msra.gmra.mrb[0].mxu0 %vm51_vm0, %v27_v5  ;;  %833 = vmatmul.mubr.msk.f32.vlgmr.msra.gmra.mrb[0].mxu1 %vm51_vm0, %v35_v6  ;;  %v40_v22 = vld [vmem:[%s1170_s0 + $0x70] sm:$0xff]  ;;  %v41_v24 = vld [vmem:[%s1170_s0 + $0x78] sm:$0xff]  ;;  %v483_v26 = vld [vmem:[%s1172_s5 + $0x8] sm:$0xff] }
   0x9   :  { %823 = vmatprep.mubr.msk.f32.mxu0 %vm51_vm0, %v28_v7  ;;  %835 = vmatprep.mubr.msk.f32.mxu1 %vm51_vm0, %v36_v8  ;;  %v484_v27 = vld [vmem:[%s1172_s5 + $0x10] sm:$0xff]  ;;  %v920_v28 = vpack.c.bf16 %v483_v26, %v482_v25  ;;  %v485_v29 = vld [vmem:[%s1172_s5 + $0x18] sm:$0xff]  ;;  %v707_v31 = vld [vmem:[%s1173_s2] ss:$0 sm:$0xff] }
   0xa   :  { %915 = vmatpush3.bf16.msra.mxu1 %v912_v12  ;;  %v924_v30 = vpack.c.bf16 %v485_v29, %v484_v27 }
   0xb   :  { %917 = vmatprep.subr.bf16.mxu1 %v916_v18  ;;  %921 = vmatprep.subr.bf16.mxu0 %v920_v28 }
   0xc   :  { %824 = vmatmul.mubr.msk.f32.gmra.mrb[2].mxu0 %vm51_vm0, %v29_v14  ;;  %836 = vmatmul.mubr.msk.f32.gmra.mrb[2].mxu1 %vm51_vm0, %v37_v15 }
   0xd   :  { %826 = vmatprep.mubr.msk.f32.mxu0 %vm51_vm0, %v30_v16  ;;  %838 = vmatprep.mubr.msk.f32.mxu1 %vm51_vm0, %v38_v17  ;;  %v724_v16 = vld [vmem:[%s1174_s4] ss:$0 sm:$0xff] }
   0xe   :  { %919 = vmatpush3.bf16.msra.mxu1 %v916_v18  ;;  %923 = vmatpush3.bf16.msra.mxu0 %v920_v28 }
   0xf   :  { %925 = vmatprep.subr.bf16.mxu0 %v924_v30 }
  0x10   :  { %827 = vmatmul.mubr.msk.f32.gmra.mrb[4].mxu0 %vm51_vm0, %v31_v19  ;;  %839 = vmatmul.mubr.msk.f32.gmra.mrb[4].mxu1 %vm51_vm0, %v39_v20 }
  0x11   :  { %829 = vmatprep.mubr.msk.f32.mxu0 %vm51_vm0, %v32_v21  ;;  %841 = vmatprep.mubr.msk.f32.mxu1 %vm51_vm0, %v40_v22 }
  0x12   :  { %927 = vmatpush3.bf16.msra.mxu0 %v924_v30 }
  0x14   :  { %830 = vmatmul.mubr.msk.f32.gmra.mrb[6].mxu0 %vm51_vm0, %v33_v23  ;;  %842 = vmatmul.mubr.msk.f32.gmra.mrb[6].mxu1 %vm51_vm0, %v41_v24 }
  0xdb   :  { %v822_v32 = vpop.f32.mrb[0].mxu0  ;;  %v834_v33 = vpop.f32.mrb[0].mxu1 }
  0xdc   :  { %v172_v34 = vadd.f32 %v822_v32, %v707_v31  ;;  %v166_v35 = vpop.f32.mrb[1].mxu0  ;;  %v206_v36 = vpop.f32.mrb[1].mxu1  ;;  %v212_v3 = vadd.f32 %v834_v33, %v707_v31 }
  0xdd   :  { %v167_v37 = vadd.f32 %v707_v31, %v166_v35  ;;  %v207_v56 = vadd.f32 %v707_v31, %v206_v36 }
  0xde   :  { %v246_v41 = vmax.f32 %v172_v34, 0.0  ;;  %v254_v6 = vmax.f32 %v212_v3, 0.0 }
  0xdf   :  { %v245_v38 = vmax.f32 %v167_v37, 0.0  ;;  %v825_v39 = vpop.f32.mrb[2].mxu0  ;;  %v837_v40 = vpop.f32.mrb[2].mxu1  ;;  %v253_v0 = vmax.f32 %v207_v56, 0.0 }
  0xe0   :  { %v182_v42 = vadd.f32 %v825_v39, %v707_v31  ;;  %v176_v43 = vpop.f32.mrb[3].mxu0  ;;  %v216_v44 = vpop.f32.mrb[3].mxu1  ;;  %v222_v7 = vadd.f32 %v837_v40, %v707_v31 }
  0xe1   :  { %v177_v45 = vadd.f32 %v707_v31, %v176_v43  ;;  %852 = vmatprep.mubr.msk.f32.mxu1 %vm272_vm1, %v245_v38  ;;  %v217_v1 = vadd.f32 %v707_v31, %v216_v44 }
  0xe2   :  { %853 = vmatmul.mubr.msk.f32.vlgmr.msra.gmra.mrb[8].mxu1 %vm272_vm1, %v246_v41  ;;  %v248_v49 = vmax.f32 %v182_v42, 0.0  ;;  %v256_v10 = vmax.f32 %v222_v7, 0.0 }
  0xe3   :  { %v247_v46 = vmax.f32 %v177_v45, 0.0  ;;  %v828_v47 = vpop.f32.mrb[4].mxu0  ;;  %v840_v48 = vpop.f32.mrb[4].mxu1  ;;  %v255_v4 = vmax.f32 %v217_v1, 0.0  ;;  %v741_v1 = vld [vmem:[%s1175_s6] ss:$0 sm:$0xff] }
  0xe4   :  { %v192_v50 = vadd.f32 %v828_v47, %v707_v31  ;;  %v186_v51 = vpop.f32.mrb[5].mxu0  ;;  %v226_v52 = vpop.f32.mrb[5].mxu1  ;;  %v232_v11 = vadd.f32 %v840_v48, %v707_v31 }
  0xe5   :  { %v187_v53 = vadd.f32 %v707_v31, %v186_v51  ;;  %855 = vmatprep.mubr.msk.f32.mxu1 %vm272_vm1, %v247_v46  ;;  %v227_v5 = vadd.f32 %v707_v31, %v226_v52 }
  0xe6   :  { %856 = vmatmul.mubr.msk.f32.gmra.mrb[10].mxu1 %vm272_vm1, %v248_v49  ;;  %v250_v58 = vmax.f32 %v192_v50, 0.0  ;;  %v258_v13 = vmax.f32 %v232_v11, 0.0 }
  0xe7   :  { %v249_v54 = vmax.f32 %v187_v53, 0.0  ;;  %v831_v55 = vpop.f32.mrb[6].mxu0  ;;  %v843_v57 = vpop.f32.mrb[6].mxu1  ;;  %v257_v8 = vmax.f32 %v227_v5, 0.0 }
  0xe8   :  { %v202_v59 = vadd.f32 %v831_v55, %v707_v31  ;;  %v196_v60 = vpop.f32.mrb[7].mxu0  ;;  %v236_v61 = vpop.f32.mrb[7].mxu1  ;;  %v242_v14 = vadd.f32 %v843_v57, %v707_v31 }
  0xe9   :  { %v197_v62 = vadd.f32 %v707_v31, %v196_v60  ;;  %858 = vmatprep.mubr.msk.f32.mxu1 %vm272_vm1, %v249_v54  ;;  %v237_v9 = vadd.f32 %v707_v31, %v236_v61 }
  0xea   :  { %859 = vmatmul.mubr.msk.f32.gmra.mrb[12].mxu1 %vm272_vm1, %v250_v58  ;;  %v252_v2 = vmax.f32 %v202_v59, 0.0  ;;  %v260_v15 = vmax.f32 %v242_v14, 0.0 }
  0xeb   :  { %v251_v63 = vmax.f32 %v197_v62, 0.0  ;;  %v259_v12 = vmax.f32 %v237_v9, 0.0 }
  0xed   :  { %861 = vmatprep.mubr.msk.f32.mxu1 %vm272_vm1, %v251_v63 }
  0xee   :  { %862 = vmatmul.mubr.msk.f32.gmra.mrb[14].mxu1 %vm272_vm1, %v252_v2 }
  0xef   :  { %864 = vmatprep.mubr.msk.f32.mxu1 %vm272_vm1, %v253_v0 }
  0xf2   :  { %865 = vmatmul.mubr.msk.f32.gmra.mrb[16].mxu1 %vm272_vm1, %v254_v6 }
  0xf3   :  { %867 = vmatprep.mubr.msk.f32.mxu1 %vm272_vm1, %v255_v4 }
  0xf6   :  { %868 = vmatmul.mubr.msk.f32.gmra.mrb[18].mxu1 %vm272_vm1, %v256_v10 }
  0xf7   :  { %870 = vmatprep.mubr.msk.f32.mxu1 %vm272_vm1, %v257_v8 }
  0xfa   :  { %871 = vmatmul.mubr.msk.f32.gmra.mrb[20].mxu1 %vm272_vm1, %v258_v13 }
  0xfb   :  { %873 = vmatprep.mubr.msk.f32.mxu1 %vm272_vm1, %v259_v12 }
  0xfe   :  { %874 = vmatmul.mubr.msk.f32.gmra.mrb[22].mxu1 %vm272_vm1, %v260_v15 }
 0x1b5   :  { %v854_v17 = vpop.f32.mrb[8].mxu1 }
 0x1b6   :  { %v393_v18 = vadd.f32 %v854_v17, %v724_v16  ;;  %v387_v19 = vpop.f32.mrb[9].mxu1 }
 0x1b7   :  { %v388_v20 = vadd.f32 %v724_v16, %v387_v19 }
 0x1b8   :  { %v467_v23 = vmax.f32 %v393_v18, 0.0 }
 0x1b9   :  { %v466_v21 = vmax.f32 %v388_v20, 0.0  ;;  %v857_v22 = vpop.f32.mrb[10].mxu1 }
 0x1ba   :  { %v403_v24 = vadd.f32 %v857_v22, %v724_v16  ;;  %v397_v25 = vpop.f32.mrb[11].mxu1 }
 0x1bb   :  { %v398_v26 = vadd.f32 %v724_v16, %v397_v25  ;;  %884 = vmatprep.mubr.msk.f32.mxu0 %vm272_vm1, %v466_v21 }
 0x1bc   :  { %885 = vmatmul.mubr.msk.f32.vlgmr.msra.gmra.mrb[8].mxu0 %vm272_vm1, %v467_v23  ;;  %v469_v29 = vmax.f32 %v403_v24, 0.0 }
 0x1bd   :  { %v468_v27 = vmax.f32 %v398_v26, 0.0  ;;  %v860_v28 = vpop.f32.mrb[12].mxu1 }
 0x1be   :  { %v413_v30 = vadd.f32 %v860_v28, %v724_v16  ;;  %v407_v31 = vpop.f32.mrb[13].mxu1 }
 0x1bf   :  { %v408_v32 = vadd.f32 %v724_v16, %v407_v31  ;;  %887 = vmatprep.mubr.msk.f32.mxu0 %vm272_vm1, %v468_v27 }
 0x1c0   :  { %888 = vmatmul.mubr.msk.f32.gmra.mrb[10].mxu0 %vm272_vm1, %v469_v29  ;;  %v471_v35 = vmax.f32 %v413_v30, 0.0 }
 0x1c1   :  { %v470_v33 = vmax.f32 %v408_v32, 0.0  ;;  %v863_v34 = vpop.f32.mrb[14].mxu1 }
 0x1c2   :  { %v423_v36 = vadd.f32 %v863_v34, %v724_v16  ;;  %v417_v37 = vpop.f32.mrb[15].mxu1 }
 0x1c3   :  { %v418_v38 = vadd.f32 %v724_v16, %v417_v37  ;;  %890 = vmatprep.mubr.msk.f32.mxu0 %vm272_vm1, %v470_v33 }
 0x1c4   :  { %891 = vmatmul.mubr.msk.f32.gmra.mrb[12].mxu0 %vm272_vm1, %v471_v35  ;;  %v473_v41 = vmax.f32 %v423_v36, 0.0 }
 0x1c5   :  { %v472_v39 = vmax.f32 %v418_v38, 0.0  ;;  %v866_v40 = vpop.f32.mrb[16].mxu1 }
 0x1c6   :  { %v433_v42 = vadd.f32 %v866_v40, %v724_v16  ;;  %v427_v43 = vpop.f32.mrb[17].mxu1 }
 0x1c7   :  { %v428_v44 = vadd.f32 %v724_v16, %v427_v43  ;;  %893 = vmatprep.mubr.msk.f32.mxu0 %vm272_vm1, %v472_v39 }
 0x1c8   :  { %894 = vmatmul.mubr.msk.f32.gmra.mrb[14].mxu0 %vm272_vm1, %v473_v41  ;;  %v475_v47 = vmax.f32 %v433_v42, 0.0 }
 0x1c9   :  { %v474_v45 = vmax.f32 %v428_v44, 0.0  ;;  %v869_v46 = vpop.f32.mrb[18].mxu1 }
 0x1ca   :  { %v443_v48 = vadd.f32 %v869_v46, %v724_v16  ;;  %v437_v49 = vpop.f32.mrb[19].mxu1 }
 0x1cb   :  { %v438_v50 = vadd.f32 %v724_v16, %v437_v49  ;;  %896 = vmatprep.mubr.msk.f32.mxu0 %vm272_vm1, %v474_v45 }
 0x1cc   :  { %897 = vmatmul.mubr.msk.f32.gmra.mrb[16].mxu0 %vm272_vm1, %v475_v47  ;;  %v477_v53 = vmax.f32 %v443_v48, 0.0 }
 0x1cd   :  { %v476_v51 = vmax.f32 %v438_v50, 0.0  ;;  %v872_v52 = vpop.f32.mrb[20].mxu1 }
 0x1ce   :  { %v453_v54 = vadd.f32 %v872_v52, %v724_v16  ;;  %v447_v55 = vpop.f32.mrb[21].mxu1 }
 0x1cf   :  { %v448_v56 = vadd.f32 %v724_v16, %v447_v55  ;;  %899 = vmatprep.mubr.msk.f32.mxu0 %vm272_vm1, %v476_v51 }
 0x1d0   :  { %900 = vmatmul.mubr.msk.f32.gmra.mrb[18].mxu0 %vm272_vm1, %v477_v53  ;;  %v479_v59 = vmax.f32 %v453_v54, 0.0 }
 0x1d1   :  { %v478_v57 = vmax.f32 %v448_v56, 0.0  ;;  %v875_v58 = vpop.f32.mrb[22].mxu1 }
 0x1d2   :  { %v463_v60 = vadd.f32 %v875_v58, %v724_v16  ;;  %v457_v61 = vpop.f32.mrb[23].mxu1 }
 0x1d3   :  { %v458_v62 = vadd.f32 %v724_v16, %v457_v61  ;;  %902 = vmatprep.mubr.msk.f32.mxu0 %vm272_vm1, %v478_v57 }
 0x1d4   :  { %903 = vmatmul.mubr.msk.f32.gmra.mrb[20].mxu0 %vm272_vm1, %v479_v59  ;;  %v481_v0 = vmax.f32 %v463_v60, 0.0 }
 0x1d5   :  { %v480_v63 = vmax.f32 %v458_v62, 0.0 }
 0x1d7   :  { %905 = vmatprep.mubr.msk.f32.mxu0 %vm272_vm1, %v480_v63 }
 0x1d8   :  { %906 = vmatmul.mubr.msk.f32.gmra.mrb[22].mxu0 %vm272_vm1, %v481_v0 }
 0x28f   :  { %v886_v2 = vpop.f32.mrb[8].mxu0 }
 0x290   :  { %v613_v3 = vadd.f32 %v886_v2, %v741_v1  ;;  %v607_v4 = vpop.f32.mrb[9].mxu0 }
 0x291   :  { %v608_v5 = vadd.f32 %v741_v1, %v607_v4 }
 0x292   :  { %688 = vst.msk [vmem:[%s1176_s7 + $0x8] sm:$0xff] %vm686_vm2, %v613_v3 }
 0x293   :  { %687 = vst.msk [vmem:[%s1176_s7] sm:$0xff] %vm686_vm2, %v608_v5  ;;  %v889_v6 = vpop.f32.mrb[10].mxu0 }
 0x294   :  { %v623_v7 = vadd.f32 %v889_v6, %v741_v1  ;;  %v617_v8 = vpop.f32.mrb[11].mxu0 }
 0x295   :  { %v618_v9 = vadd.f32 %v741_v1, %v617_v8 }
 0x296   :  { %690 = vst.msk [vmem:[%s1176_s7 + $0x18] sm:$0xff] %vm686_vm2, %v623_v7 }
 0x297   :  { %689 = vst.msk [vmem:[%s1176_s7 + $0x10] sm:$0xff] %vm686_vm2, %v618_v9  ;;  %v892_v10 = vpop.f32.mrb[12].mxu0 }
 0x298   :  { %v633_v11 = vadd.f32 %v892_v10, %v741_v1  ;;  %v627_v12 = vpop.f32.mrb[13].mxu0 }
 0x299   :  { %v628_v13 = vadd.f32 %v741_v1, %v627_v12 }
 0x29a   :  { %692 = vst.msk [vmem:[%s1176_s7 + $0x28] sm:$0xff] %vm686_vm2, %v633_v11 }
 0x29b   :  { %691 = vst.msk [vmem:[%s1176_s7 + $0x20] sm:$0xff] %vm686_vm2, %v628_v13  ;;  %v895_v14 = vpop.f32.mrb[14].mxu0 }
 0x29c   :  { %v643_v15 = vadd.f32 %v895_v14, %v741_v1  ;;  %v637_v16 = vpop.f32.mrb[15].mxu0 }
 0x29d   :  { %v638_v17 = vadd.f32 %v741_v1, %v637_v16 }
 0x29e   :  { %694 = vst.msk [vmem:[%s1176_s7 + $0x38] sm:$0xff] %vm686_vm2, %v643_v15 }
 0x29f   :  { %693 = vst.msk [vmem:[%s1176_s7 + $0x30] sm:$0xff] %vm686_vm2, %v638_v17  ;;  %v898_v18 = vpop.f32.mrb[16].mxu0 }
 0x2a0   :  { %v653_v19 = vadd.f32 %v898_v18, %v741_v1  ;;  %v647_v20 = vpop.f32.mrb[17].mxu0 }
 0x2a1   :  { %v648_v21 = vadd.f32 %v741_v1, %v647_v20 }
 0x2a2   :  { %696 = vst.msk [vmem:[%s1176_s7 + $0x48] sm:$0xff] %vm686_vm2, %v653_v19 }
 0x2a3   :  { %695 = vst.msk [vmem:[%s1176_s7 + $0x40] sm:$0xff] %vm686_vm2, %v648_v21  ;;  %v901_v22 = vpop.f32.mrb[18].mxu0 }
 0x2a4   :  { %v663_v23 = vadd.f32 %v901_v22, %v741_v1  ;;  %v657_v24 = vpop.f32.mrb[19].mxu0 }
 0x2a5   :  { %v658_v25 = vadd.f32 %v741_v1, %v657_v24 }
 0x2a6   :  { %698 = vst.msk [vmem:[%s1176_s7 + $0x58] sm:$0xff] %vm686_vm2, %v663_v23 }
 0x2a7   :  { %697 = vst.msk [vmem:[%s1176_s7 + $0x50] sm:$0xff] %vm686_vm2, %v658_v25  ;;  %v904_v26 = vpop.f32.mrb[20].mxu0 }
 0x2a8   :  { %v673_v27 = vadd.f32 %v904_v26, %v741_v1  ;;  %v667_v28 = vpop.f32.mrb[21].mxu0 }
 0x2a9   :  { %v668_v29 = vadd.f32 %v741_v1, %v667_v28 }
 0x2aa   :  { %700 = vst.msk [vmem:[%s1176_s7 + $0x68] sm:$0xff] %vm686_vm2, %v673_v27 }
 0x2ab   :  { %699 = vst.msk [vmem:[%s1176_s7 + $0x60] sm:$0xff] %vm686_vm2, %v668_v29  ;;  %v907_v30 = vpop.f32.mrb[22].mxu0 }
 0x2ac   :  { %v683_v31 = vadd.f32 %v907_v30, %v741_v1  ;;  %v677_v32 = vpop.f32.mrb[23].mxu0 }
 0x2ad   :  { %v678_v33 = vadd.f32 %v741_v1, %v677_v32 }
 0x2ae   :  { %702 = vst.msk [vmem:[%s1176_s7 + $0x78] sm:$0xff] %vm686_vm2, %v683_v31 }
 0x2af   :  { %701 = vst.msk [vmem:[%s1176_s7 + $0x70] sm:$0xff] %vm686_vm2, %v678_v33 }

</bundles_post_ra>
